<compile_context>
chip_gen: v7x
topology: tpu7x:2x2x1
jax: 0.10.0
libtpu: 0.0.40
codegen_flags: <defaults>
</compile_context>

<pallas_src>
import functools

import jax
import jax.numpy as jnp
from jax import lax
from jax.experimental import pallas as pl
from jax.experimental.pallas import tpu as pltpu

_LANES = 128
_ROW_ALIGN = 32                 # sublane multiple valid for f32 / bf16 / fp8 packing
_MAX_BLOCK_ROWS = 4096          # (4096,128) f32 = 2 MiB/block; x+t double-buffered = 8 MiB
_MAX_BLOCK_ROWS_COUNTS = 8192   # count pass streams only t
_VMEM_LIMIT_BYTES = 32 * 1024 * 1024


# ------------------------------------------------------------------ helpers -
def _stable_bce(x, t):
    # Numerically stable BCE-with-logits (same form PyTorch uses):
    #   max(x, 0) - x*t + log1p(exp(-|x|))
    return jnp.maximum(x, 0.0) - x * t + jnp.log1p(jnp.exp(-jnp.abs(x)))


def _vreg_sum(a):
    """(block_rows, 128) -> (8, 128): sum 8-sublane groups (pure VPU adds)."""
    r = a.shape[0]
    return a.reshape(r // 8, 8, _LANES).sum(axis=0)


def _choose_block_rows(rows, max_rows):
    aligned = ((rows + _ROW_ALIGN - 1) // _ROW_ALIGN) * _ROW_ALIGN
    return min(max_rows, aligned)


# ------------------------------------------------------------------ kernels -
def _fused_kernel(x_ref, t_ref, out_ref,
                  pos_cnt, neg_cnt, pos_loss, neg_loss,
                  *, total_blocks, block_rows, rows, need_mask, padded):
    """Single pass over (x, t): pos/neg counts and pos/neg BCE sums per core."""
    c = pl.program_id(0)
    i = pl.program_id(1)
    gblk = c * pl.num_programs(1) + i

    @pl.when(i == 0)
    def _():
        pos_cnt[...] = jnp.zeros_like(pos_cnt)
        neg_cnt[...] = jnp.zeros_like(neg_cnt)
        pos_loss[...] = jnp.zeros_like(pos_loss)
        neg_loss[...] = jnp.zeros_like(neg_loss)

    def accumulate(mask_rows):
        x = x_ref[...].astype(jnp.float32)
        t = t_ref[...].astype(jnp.float32)
        bce = _stable_bce(x, t)
        pos = t == 1.0
        neg = t == 0.0
        if mask_rows:
            row = lax.broadcasted_iota(jnp.int32, (block_rows, _LANES), 0)
            valid = row < (rows - gblk * block_rows)
            pos = jnp.logical_and(pos, valid)
            neg = jnp.logical_and(neg, valid)
        # Keep selects (not mask-multiplies): NaN/Inf from edge-padded garbage
        # x must not leak into the sums.
        pos_cnt[...] += _vreg_sum(pos.astype(jnp.float32))
        neg_cnt[...] += _vreg_sum(neg.astype(jnp.float32))
        pos_loss[...] += _vreg_sum(jnp.where(pos, bce, 0.0))
        neg_loss[...] += _vreg_sum(jnp.where(neg, bce, 0.0))

    last = total_blocks - 1
    if need_mask:
        @pl.when(gblk < last)
        def _():
            accumulate(False)

        @pl.when(gblk == last)
        def _():
            accumulate(True)
    elif padded:
        @pl.when(gblk <= last)
        def _():
            accumulate(False)
    else:
        accumulate(False)

    @pl.when(i == pl.num_programs(1) - 1)
    def _():
        out_ref[0, 0:8, :] = pos_cnt[...]
        out_ref[0, 8:16, :] = neg_cnt[...]
        out_ref[0, 16:24, :] = pos_loss[...]
        out_ref[0, 24:32, :] = neg_loss[...]


def _count_kernel(t_ref, out_ref, pos_cnt, neg_cnt,
                  *, total_blocks, block_rows, rows, need_mask):
    """Counts only (reduction='none' needs alpha/beta before the weighted pass)."""
    i = pl.program_id(0)

    @pl.when(i == 0)
    def _():
        pos_cnt[...] = jnp.zeros_like(pos_cnt)
        neg_cnt[...] = jnp.zeros_like(neg_cnt)

    def accumulate(mask_rows):
        t = t_ref[...].astype(jnp.float32)
        pos = t == 1.0
        neg = t == 0.0
        if mask_rows:
            row = lax.broadcasted_iota(jnp.int32, (block_rows, _LANES), 0)
            valid = row < (rows - i * block_rows)
            pos = jnp.logical_and(pos, valid)
            neg = jnp.logical_and(neg, valid)
        pos_cnt[...] += _vreg_sum(pos.astype(jnp.float32))
        neg_cnt[...] += _vreg_sum(neg.astype(jnp.float32))

    last = total_blocks - 1
    if need_mask:
        @pl.when(i < last)
        def _():
            accumulate(False)

        @pl.when(i == last)
        def _():
            accumulate(True)
    else:
        accumulate(False)

    @pl.when(i == last)
    def _():
        out_ref[0:8, :] = pos_cnt[...]
        out_ref[8:16, :] = neg_cnt[...]


def _weighted_kernel(ab_ref, x_ref, t_ref, out_ref):
    """Elementwise weighted BCE-with-logits (reduction='none')."""
    alpha = ab_ref[0]
    beta = ab_ref[1]
    x = x_ref[...].astype(jnp.float32)
    t = t_ref[...].astype(jnp.float32)
    w = jnp.where(t == 1.0, alpha, jnp.where(t == 0.0, beta, 0.0))
    out_ref[...] = (w * _stable_bce(x, t)).astype(out_ref.dtype)


# ----------------------------------------------------------------- wrappers -
def _fused_reduce(x2d, t2d):
    rows = x2d.shape[0]
    block_rows = _choose_block_rows(rows, _MAX_BLOCK_ROWS)
    nb = pl.cdiv(rows, block_rows)
    num_cores = 2 if nb >= 2 else 1           # shard reduction across TCs (v7x)
    steps = pl.cdiv(nb, num_cores)
    padded = (num_cores * steps) != nb
    need_mask = (rows % block_rows) != 0

    def in_map(c, i):
        g = c * steps + i
        if padded:
            g = jnp.minimum(g, nb - 1)        # clamp; kernel skips the duplicate
        return (g, 0)

    kernel = functools.partial(
        _fused_kernel, total_blocks=nb, block_rows=block_rows, rows=rows,
        need_mask=need_mask, padded=padded)

    out = pl.pallas_call(
        kernel,
        out_shape=jax.ShapeDtypeStruct((num_cores, 32, _LANES), jnp.float32),
        grid=(num_cores, steps),
        in_specs=[pl.BlockSpec((block_rows, _LANES), in_map),
                  pl.BlockSpec((block_rows, _LANES), in_map)],
        out_specs=pl.BlockSpec((1, 32, _LANES), lambda c, i: (c, 0, 0)),
        scratch_shapes=[pltpu.VMEM((8, _LANES), jnp.float32)] * 4,
        compiler_params=pltpu.CompilerParams(
            dimension_semantics=("parallel", "arbitrary"),
            vmem_limit_bytes=_VMEM_LIMIT_BYTES),
    )(x2d, t2d)
    parts = out.reshape(num_cores, 4, 8, _LANES).sum(axis=(0, 2, 3))
    return parts[0], parts[1], parts[2], parts[3]


def _counts(t2d):
    rows = t2d.shape[0]
    block_rows = _choose_block_rows(rows, _MAX_BLOCK_ROWS_COUNTS)
    nb = pl.cdiv(rows, block_rows)
    need_mask = (rows % block_rows) != 0
    kernel = functools.partial(
        _count_kernel, total_blocks=nb, block_rows=block_rows, rows=rows,
        need_mask=need_mask)
    out = pl.pallas_call(
        kernel,
        out_shape=jax.ShapeDtypeStruct((16, _LANES), jnp.float32),
        grid=(nb,),
        in_specs=[pl.BlockSpec((block_rows, _LANES), lambda i: (i, 0))],
        out_specs=pl.BlockSpec((16, _LANES), lambda i: (0, 0)),
        scratch_shapes=[pltpu.VMEM((8, _LANES), jnp.float32)] * 2,
        compiler_params=pltpu.CompilerParams(
            dimension_semantics=("arbitrary",),
            vmem_limit_bytes=_VMEM_LIMIT_BYTES),
    )(t2d)
    parts = out.reshape(2, 8, _LANES).sum(axis=(1, 2))
    return parts[0], parts[1]


def _weighted_none(ab, x2d, t2d):
    rows = x2d.shape[0]
    block_rows = _choose_block_rows(rows, _MAX_BLOCK_ROWS)
    grid = (pl.cdiv(rows, block_rows),)
    return pl.pallas_call(
        _weighted_kernel,
        out_shape=jax.ShapeDtypeStruct((rows, _LANES), x2d.dtype),
        grid=grid,
        in_specs=[pl.BlockSpec(memory_space=pltpu.SMEM),
                  pl.BlockSpec((block_rows, _LANES), lambda i: (i, 0)),
                  pl.BlockSpec((block_rows, _LANES), lambda i: (i, 0))],
        out_specs=pl.BlockSpec((block_rows, _LANES), lambda i: (i, 0)),
        compiler_params=pltpu.CompilerParams(
            dimension_semantics=("parallel",),
            vmem_limit_bytes=_VMEM_LIMIT_BYTES),
    )(ab, x2d, t2d)


def bce2d_new(input, target, reduction="mean"):
    """Forward pass of the PyTorch bce2d_new module (class-balanced BCE-with-logits).

    Notes:
      * The PyTorch module's literal default `reduction=None` raises inside
        F.binary_cross_entropy_with_logits; we treat None as the usual 'mean'.
      * alpha/beta become NaN when target has no exact 0.0/1.0 entries — same
        as the reference's 0/0 division.
    """
    if reduction is None:
        reduction = "mean"
    orig_shape = input.shape
    n = input.size

    def _as_float(a):
        return a if jnp.issubdtype(a.dtype, jnp.floating) else a.astype(jnp.float32)

    # bf16/f16 pass through at native width (upcast inside the kernel).
    flat_x = _as_float(input).reshape(-1)
    flat_t = _as_float(target).reshape(-1)

    rem = n % _LANES          # <128-element tail handled in plain JAX
    bulk = n - rem
    bulk_rows = bulk // _LANES
    has_bulk = bulk_rows > 0

    if has_bulk:
        if rem:
            # TODO(synk): this prefix slice may materialize an HBM copy; if
            # profiles show it, move the ragged tail into the kernel with an
            # element-index mask instead of slicing.
            x2d = flat_x[:bulk].reshape(bulk_rows, _LANES)
            t2d = flat_t[:bulk].reshape(bulk_rows, _LANES)
        else:  # pure reshape, zero extra HBM traffic
            x2d = flat_x.reshape(bulk_rows, _LANES)
            t2d = flat_t.reshape(bulk_rows, _LANES)

    if rem:
        x_tail = flat_x[bulk:].astype(jnp.float32)
        t_tail = flat_t[bulk:].astype(jnp.float32)
        pos_tail = t_tail == 1.0
        neg_tail = t_tail == 0.0
        bce_tail = _stable_bce(x_tail, t_tail)
        tail_pos_cnt = jnp.sum(pos_tail.astype(jnp.float32))
        tail_neg_cnt = jnp.sum(neg_tail.astype(jnp.float32))
    else:
        tail_pos_cnt = tail_neg_cnt = jnp.float32(0.0)

    if reduction in ("mean", "sum"):
        if has_bulk:
            num_pos, num_neg, pos_loss, neg_loss = _fused_reduce(x2d, t2d)
        else:
            num_pos = num_neg = pos_loss = neg_loss = jnp.float32(0.0)
        if rem:
            num_pos = num_pos + tail_pos_cnt
            num_neg = num_neg + tail_neg_cnt
            pos_loss = pos_loss + jnp.sum(jnp.where(pos_tail, bce_tail, 0.0))
            neg_loss = neg_loss + jnp.sum(jnp.where(neg_tail, bce_tail, 0.0))
        num_total = num_pos + num_neg
        alpha = num_neg / num_total
        beta = 1.1 * num_pos / num_total
        # Weights separate algebraically: sum(w*l) = alpha*sum_pos + beta*sum_neg.
        loss_sum = alpha * pos_loss + beta * neg_loss
        if reduction == "sum":
            return loss_sum
        return loss_sum / jnp.float32(n)  # 'mean': divide by numel

    if reduction == "none":
        if has_bulk:
            num_pos, num_neg = _counts(t2d)
        else:
            num_pos = num_neg = jnp.float32(0.0)
        num_pos = num_pos + tail_pos_cnt
        num_neg = num_neg + tail_neg_cnt
        num_total = num_pos + num_neg
        alpha = num_neg / num_total
        beta = 1.1 * num_pos / num_total
        ab = jnp.stack([alpha, beta]).astype(jnp.float32)
        out_dtype = flat_x.dtype
        pieces = []
        if has_bulk:
            pieces.append(_weighted_none(ab, x2d, t2d).reshape(-1).astype(out_dtype))
        if rem:
            w_tail = jnp.where(pos_tail, alpha, jnp.where(neg_tail, beta, 0.0))
            pieces.append((w_tail * bce_tail).astype(out_dtype))
        out = pieces[0] if len(pieces) == 1 else jnp.concatenate(pieces)
        return out.reshape(orig_shape)

    raise ValueError(f"unsupported reduction: {reduction!r}")


# -------------------------------------------------------------- reference ---
def _ref_bce2d_new(x, t, reduction):
    pos = (t == 1.0).astype(jnp.float32)
    neg = (t == 0.0).astype(jnp.float32)
    num_pos = jnp.sum(pos)
    num_neg = jnp.sum(neg)
    num_total = num_pos + num_neg
    alpha = num_neg / num_total
    beta = 1.1 * num_pos / num_total
    w = alpha * pos + beta * neg
    loss = w * _stable_bce(x.astype(jnp.float32), t.astype(jnp.float32))
    if reduction == "none":
        return loss
    if reduction == "sum":
        return jnp.sum(loss)
    return jnp.sum(loss) / jnp.float32(x.size)


if __name__ == "__main__":
    key = jax.random.PRNGKey(0)
    k1, k2 = jax.random.split(key)
    B, C, H, W = 2, 4, 16, 16
    logits = jax.random.normal(k1, (B, C, H, W), dtype=jnp.float32)
    target = (jax.random.uniform(k2, (B, C, H, W)) > 0.5).astype(jnp.float32)

    out_mean = jax.block_until_ready(bce2d_new(logits, target, "mean"))
    out_sum = jax.block_until_ready(bce2d_new(logits, target, "sum"))
    out_none = jax.block_until_ready(bce2d_new(logits, target, "none"))

    assert jnp.allclose(out_mean, _ref_bce2d_new(logits, target, "mean"),
                        rtol=1e-4, atol=1e-5)
    assert jnp.allclose(out_sum, _ref_bce2d_new(logits, target, "sum"),
                        rtol=1e-4, atol=1e-4)
    assert jnp.allclose(out_none, _ref_bce2d_new(logits, target, "none"),
                        rtol=1e-4, atol=1e-5)

    print("KERNEL_OK")
</pallas_src>

<mosaic_0001>
module attributes {stable_mosaic.version = 11 : i64} {
  func.func @_fused_kernel(%arg0: i32, %arg1: i32, %arg2: memref<32x128xf32, #tpu.memory_space<vmem>>, %arg3: memref<32x128xf32, #tpu.memory_space<vmem>>, %arg4: memref<1x32x128xf32, #tpu.memory_space<vmem>>, %arg5: memref<8x128xf32, #tpu.memory_space<vmem>>, %arg6: memref<8x128xf32, #tpu.memory_space<vmem>>, %arg7: memref<8x128xf32, #tpu.memory_space<vmem>>, %arg8: memref<8x128xf32, #tpu.memory_space<vmem>>) attributes {dimension_semantics = [#tpu.dimension_semantics<parallel>, #tpu.dimension_semantics<arbitrary>], iteration_bounds = array<i64: 1, 1>, scalar_prefetch = 0 : i64, scratch_operands = 4 : i64, tpu.core_type = #tpu.core_type<tc>, window_params = [{transform_indices = @transform_0, window_bounds = array<i64: 32, 128>}, {transform_indices = @transform_1, window_bounds = array<i64: 32, 128>}, {transform_indices = @transform_2, window_bounds = array<i64: 1, 32, 128>}]} {
    %c1_i32 = arith.constant 1 : i32
    %0 = arith.muli %arg0, %c1_i32 : i32
    %1 = arith.addi %0, %arg1 : i32
    %c0_i32 = arith.constant 0 : i32
    %2 = arith.cmpi eq, %arg1, %c0_i32 : i32
    %3 = arith.extui %2 : i1 to i32
    %c0_i32_0 = arith.constant 0 : i32
    %4 = arith.cmpi ne, %3, %c0_i32_0 : i32
    scf.if %4 {
      %cst = arith.constant 0.000000e+00 : f32
      %14 = vector.broadcast %cst : f32 to vector<8x128xf32>
      %c0 = arith.constant 0 : index
      %c0_7 = arith.constant 0 : index
      %15 = vector.load %arg5[%c0, %c0_7] : memref<8x128xf32, #tpu.memory_space<vmem>>, vector<8x128xf32>
      tpu.vector_store %arg5[%c0, %c0_7], %14 {strides = array<i32>} : memref<8x128xf32, #tpu.memory_space<vmem>>, vector<8x128xf32>,
      %cst_8 = arith.constant 0.000000e+00 : f32
      %16 = vector.broadcast %cst_8 : f32 to vector<8x128xf32>
      %c0_9 = arith.constant 0 : index
      %c0_10 = arith.constant 0 : index
      %17 = vector.load %arg6[%c0_9, %c0_10] : memref<8x128xf32, #tpu.memory_space<vmem>>, vector<8x128xf32>
      tpu.vector_store %arg6[%c0_9, %c0_10], %16 {strides = array<i32>} : memref<8x128xf32, #tpu.memory_space<vmem>>, vector<8x128xf32>,
      %cst_11 = arith.constant 0.000000e+00 : f32
      %18 = vector.broadcast %cst_11 : f32 to vector<8x128xf32>
      %c0_12 = arith.constant 0 : index
      %c0_13 = arith.constant 0 : index
      %19 = vector.load %arg7[%c0_12, %c0_13] : memref<8x128xf32, #tpu.memory_space<vmem>>, vector<8x128xf32>
      tpu.vector_store %arg7[%c0_12, %c0_13], %18 {strides = array<i32>} : memref<8x128xf32, #tpu.memory_space<vmem>>, vector<8x128xf32>,
      %cst_14 = arith.constant 0.000000e+00 : f32
      %20 = vector.broadcast %cst_14 : f32 to vector<8x128xf32>
      %c0_15 = arith.constant 0 : index
      %c0_16 = arith.constant 0 : index
      %21 = vector.load %arg8[%c0_15, %c0_16] : memref<8x128xf32, #tpu.memory_space<vmem>>, vector<8x128xf32>
      tpu.vector_store %arg8[%c0_15, %c0_16], %20 {strides = array<i32>} : memref<8x128xf32, #tpu.memory_space<vmem>>, vector<8x128xf32>,
    } else {
    }
    %c0_i32_1 = arith.constant 0 : i32
    %5 = arith.cmpi slt, %1, %c0_i32_1 : i32
    %6 = arith.extui %5 : i1 to i32
    %c0_i32_2 = arith.constant 0 : i32
    %7 = arith.cmpi ne, %6, %c0_i32_2 : i32
    scf.if %7 {
      %c0 = arith.constant 0 : index
      %c0_7 = arith.constant 0 : index
      %14 = vector.load %arg2[%c0, %c0_7] : memref<32x128xf32, #tpu.memory_space<vmem>>, vector<32x128xf32>
      %c0_8 = arith.constant 0 : index
      %c0_9 = arith.constant 0 : index
      %15 = vector.load %arg3[%c0_8, %c0_9] : memref<32x128xf32, #tpu.memory_space<vmem>>, vector<32x128xf32>
      %cst = arith.constant 0.000000e+00 : f32
      %16 = vector.broadcast %cst : f32 to vector<32x128xf32>
      %17 = arith.maximumf %14, %16 : vector<32x128xf32>
      %18 = arith.mulf %14, %15 : vector<32x128xf32>
      %19 = arith.subf %17, %18 : vector<32x128xf32>
      %20 = math.absf %14 : vector<32x128xf32>
      %cst_10 = arith.constant 0.000000e+00 : f32
      %21 = vector.broadcast %cst_10 : f32 to vector<32x128xf32>
      %22 = arith.subf %21, %20 : vector<32x128xf32>
      %23 = math.exp %22 : vector<32x128xf32>
      %24 = math.log1p %23 : vector<32x128xf32>
      %25 = arith.addf %19, %24 : vector<32x128xf32>
      %cst_11 = arith.constant 1.000000e+00 : f32
      %26 = vector.broadcast %cst_11 : f32 to vector<32x128xf32>
      %27 = arith.cmpf oeq, %15, %26 : vector<32x128xf32>
      %cst_12 = arith.constant 0.000000e+00 : f32
      %28 = vector.broadcast %cst_12 : f32 to vector<32x128xf32>
      %29 = arith.cmpf oeq, %15, %28 : vector<32x128xf32>
      %c0_13 = arith.constant 0 : index
      %c0_14 = arith.constant 0 : index
      %30 = vector.load %arg5[%c0_13, %c0_14] : memref<8x128xf32, #tpu.memory_space<vmem>>, vector<8x128xf32>
      %31 = arith.extui %27 : vector<32x128xi1> to vector<32x128xi32>
      %32 = arith.sitofp %31 : vector<32x128xi32> to vector<32x128xf32>
      %33 = vector.shape_cast %32 : vector<32x128xf32> to vector<4x8x128xf32>
      %cst_15 = arith.constant dense<0.000000e+00> : vector<8x128xf32>
      %34 = vector.multi_reduction <add>, %33, %cst_15 [0] : vector<4x8x128xf32> to vector<8x128xf32>
      %35 = arith.addf %30, %34 : vector<8x128xf32>
      %c0_16 = arith.constant 0 : index
      %c0_17 = arith.constant 0 : index
      %36 = vector.load %arg5[%c0_16, %c0_17] : memref<8x128xf32, #tpu.memory_space<vmem>>, vector<8x128xf32>
      tpu.vector_store %arg5[%c0_16, %c0_17], %35 {strides = array<i32>} : memref<8x128xf32, #tpu.memory_space<vmem>>, vector<8x128xf32>,
      %c0_18 = arith.constant 0 : index
      %c0_19 = arith.constant 0 : index
      %37 = vector.load %arg6[%c0_18, %c0_19] : memref<8x128xf32, #tpu.memory_space<vmem>>, vector<8x128xf32>
      %38 = arith.extui %29 : vector<32x128xi1> to vector<32x128xi32>
      %39 = arith.sitofp %38 : vector<32x128xi32> to vector<32x128xf32>
      %40 = vector.shape_cast %39 : vector<32x128xf32> to vector<4x8x128xf32>
      %cst_20 = arith.constant dense<0.000000e+00> : vector<8x128xf32>
      %41 = vector.multi_reduction <add>, %40, %cst_20 [0] : vector<4x8x128xf32> to vector<8x128xf32>
      %42 = arith.addf %37, %41 : vector<8x128xf32>
      %c0_21 = arith.constant 0 : index
      %c0_22 = arith.constant 0 : index
      %43 = vector.load %arg6[%c0_21, %c0_22] : memref<8x128xf32, #tpu.memory_space<vmem>>, vector<8x128xf32>
      tpu.vector_store %arg6[%c0_21, %c0_22], %42 {strides = array<i32>} : memref<8x128xf32, #tpu.memory_space<vmem>>, vector<8x128xf32>,
      %c0_23 = arith.constant 0 : index
      %c0_24 = arith.constant 0 : index
      %44 = vector.load %arg7[%c0_23, %c0_24] : memref<8x128xf32, #tpu.memory_space<vmem>>, vector<8x128xf32>
      %cst_25 = arith.constant 0.000000e+00 : f32
      %45 = vector.broadcast %cst_25 : f32 to vector<32x128xf32>
      %46 = arith.select %27, %25, %45 : vector<32x128xi1>, vector<32x128xf32>
      %47 = vector.shape_cast %46 : vector<32x128xf32> to vector<4x8x128xf32>
      %cst_26 = arith.constant dense<0.000000e+00> : vector<8x128xf32>
      %48 = vector.multi_reduction <add>, %47, %cst_26 [0] : vector<4x8x128xf32> to vector<8x128xf32>
      %49 = arith.addf %44, %48 : vector<8x128xf32>
      %c0_27 = arith.constant 0 : index
      %c0_28 = arith.constant 0 : index
      %50 = vector.load %arg7[%c0_27, %c0_28] : memref<8x128xf32, #tpu.memory_space<vmem>>, vector<8x128xf32>
      tpu.vector_store %arg7[%c0_27, %c0_28], %49 {strides = array<i32>} : memref<8x128xf32, #tpu.memory_space<vmem>>, vector<8x128xf32>,
      %c0_29 = arith.constant 0 : index
      %c0_30 = arith.constant 0 : index
      %51 = vector.load %arg8[%c0_29, %c0_30] : memref<8x128xf32, #tpu.memory_space<vmem>>, vector<8x128xf32>
      %cst_31 = arith.constant 0.000000e+00 : f32
      %52 = vector.broadcast %cst_31 : f32 to vector<32x128xf32>
      %53 = arith.select %29, %25, %52 : vector<32x128xi1>, vector<32x128xf32>
      %54 = vector.shape_cast %53 : vector<32x128xf32> to vector<4x8x128xf32>
      %cst_32 = arith.constant dense<0.000000e+00> : vector<8x128xf32>
      %55 = vector.multi_reduction <add>, %54, %cst_32 [0] : vector<4x8x128xf32> to vector<8x128xf32>
      %56 = arith.addf %51, %55 : vector<8x128xf32>
      %c0_33 = arith.constant 0 : index
      %c0_34 = arith.constant 0 : index
      %57 = vector.load %arg8[%c0_33, %c0_34] : memref<8x128xf32, #tpu.memory_space<vmem>>, vector<8x128xf32>
      tpu.vector_store %arg8[%c0_33, %c0_34], %56 {strides = array<i32>} : memref<8x128xf32, #tpu.memory_space<vmem>>, vector<8x128xf32>,
    } else {
    }
    %c0_i32_3 = arith.constant 0 : i32
    %8 = arith.cmpi eq, %1, %c0_i32_3 : i32
    %9 = arith.extui %8 : i1 to i32
    %c0_i32_4 = arith.constant 0 : i32
    %10 = arith.cmpi ne, %9, %c0_i32_4 : i32
    scf.if %10 {
      %c0 = arith.constant 0 : index
      %c0_7 = arith.constant 0 : index
      %14 = vector.load %arg2[%c0, %c0_7] : memref<32x128xf32, #tpu.memory_space<vmem>>, vector<32x128xf32>
      %c0_8 = arith.constant 0 : index
      %c0_9 = arith.constant 0 : index
      %15 = vector.load %arg3[%c0_8, %c0_9] : memref<32x128xf32, #tpu.memory_space<vmem>>, vector<32x128xf32>
      %cst = arith.constant 0.000000e+00 : f32
      %16 = vector.broadcast %cst : f32 to vector<32x128xf32>
      %17 = arith.maximumf %14, %16 : vector<32x128xf32>
      %18 = arith.mulf %14, %15 : vector<32x128xf32>
      %19 = arith.subf %17, %18 : vector<32x128xf32>
      %20 = math.absf %14 : vector<32x128xf32>
      %cst_10 = arith.constant 0.000000e+00 : f32
      %21 = vector.broadcast %cst_10 : f32 to vector<32x128xf32>
      %22 = arith.subf %21, %20 : vector<32x128xf32>
      %23 = math.exp %22 : vector<32x128xf32>
      %24 = math.log1p %23 : vector<32x128xf32>
      %25 = arith.addf %19, %24 : vector<32x128xf32>
      %cst_11 = arith.constant 1.000000e+00 : f32
      %26 = vector.broadcast %cst_11 : f32 to vector<32x128xf32>
      %27 = arith.cmpf oeq, %15, %26 : vector<32x128xf32>
      %cst_12 = arith.constant 0.000000e+00 : f32
      %28 = vector.broadcast %cst_12 : f32 to vector<32x128xf32>
      %29 = arith.cmpf oeq, %15, %28 : vector<32x128xf32>
      %30 = tpu.iota {dimensions = array<i32: 0>} : vector<32x128xi32>
      %c32_i32 = arith.constant 32 : i32
      %31 = arith.muli %1, %c32_i32 : i32
      %c16_i32 = arith.constant 16 : i32
      %32 = arith.subi %c16_i32, %31 : i32
      %33 = vector.broadcast %32 : i32 to vector<32x128xi32>
      %34 = arith.cmpi slt, %30, %33 : vector<32x128xi32>
      %35 = arith.andi %27, %34 : vector<32x128xi1>
      %36 = arith.andi %29, %34 : vector<32x128xi1>
      %c0_13 = arith.constant 0 : index
      %c0_14 = arith.constant 0 : index
      %37 = vector.load %arg5[%c0_13, %c0_14] : memref<8x128xf32, #tpu.memory_space<vmem>>, vector<8x128xf32>
      %38 = arith.extui %35 : vector<32x128xi1> to vector<32x128xi32>
      %39 = arith.sitofp %38 : vector<32x128xi32> to vector<32x128xf32>
      %40 = vector.shape_cast %39 : vector<32x128xf32> to vector<4x8x128xf32>
      %cst_15 = arith.constant dense<0.000000e+00> : vector<8x128xf32>
      %41 = vector.multi_reduction <add>, %40, %cst_15 [0] : vector<4x8x128xf32> to vector<8x128xf32>
      %42 = arith.addf %37, %41 : vector<8x128xf32>
      %c0_16 = arith.constant 0 : index
      %c0_17 = arith.constant 0 : index
      %43 = vector.load %arg5[%c0_16, %c0_17] : memref<8x128xf32, #tpu.memory_space<vmem>>, vector<8x128xf32>
      tpu.vector_store %arg5[%c0_16, %c0_17], %42 {strides = array<i32>} : memref<8x128xf32, #tpu.memory_space<vmem>>, vector<8x128xf32>,
      %c0_18 = arith.constant 0 : index
      %c0_19 = arith.constant 0 : index
      %44 = vector.load %arg6[%c0_18, %c0_19] : memref<8x128xf32, #tpu.memory_space<vmem>>, vector<8x128xf32>
      %45 = arith.extui %36 : vector<32x128xi1> to vector<32x128xi32>
      %46 = arith.sitofp %45 : vector<32x128xi32> to vector<32x128xf32>
      %47 = vector.shape_cast %46 : vector<32x128xf32> to vector<4x8x128xf32>
      %cst_20 = arith.constant dense<0.000000e+00> : vector<8x128xf32>
      %48 = vector.multi_reduction <add>, %47, %cst_20 [0] : vector<4x8x128xf32> to vector<8x128xf32>
      %49 = arith.addf %44, %48 : vector<8x128xf32>
      %c0_21 = arith.constant 0 : index
      %c0_22 = arith.constant 0 : index
      %50 = vector.load %arg6[%c0_21, %c0_22] : memref<8x128xf32, #tpu.memory_space<vmem>>, vector<8x128xf32>
      tpu.vector_store %arg6[%c0_21, %c0_22], %49 {strides = array<i32>} : memref<8x128xf32, #tpu.memory_space<vmem>>, vector<8x128xf32>,
      %c0_23 = arith.constant 0 : index
      %c0_24 = arith.constant 0 : index
      %51 = vector.load %arg7[%c0_23, %c0_24] : memref<8x128xf32, #tpu.memory_space<vmem>>, vector<8x128xf32>
      %cst_25 = arith.constant 0.000000e+00 : f32
      %52 = vector.broadcast %cst_25 : f32 to vector<32x128xf32>
      %53 = arith.select %35, %25, %52 : vector<32x128xi1>, vector<32x128xf32>
      %54 = vector.shape_cast %53 : vector<32x128xf32> to vector<4x8x128xf32>
      %cst_26 = arith.constant dense<0.000000e+00> : vector<8x128xf32>
      %55 = vector.multi_reduction <add>, %54, %cst_26 [0] : vector<4x8x128xf32> to vector<8x128xf32>
      %56 = arith.addf %51, %55 : vector<8x128xf32>
      %c0_27 = arith.constant 0 : index
      %c0_28 = arith.constant 0 : index
      %57 = vector.load %arg7[%c0_27, %c0_28] : memref<8x128xf32, #tpu.memory_space<vmem>>, vector<8x128xf32>
      tpu.vector_store %arg7[%c0_27, %c0_28], %56 {strides = array<i32>} : memref<8x128xf32, #tpu.memory_space<vmem>>, vector<8x128xf32>,
      %c0_29 = arith.constant 0 : index
      %c0_30 = arith.constant 0 : index
      %58 = vector.load %arg8[%c0_29, %c0_30] : memref<8x128xf32, #tpu.memory_space<vmem>>, vector<8x128xf32>
      %cst_31 = arith.constant 0.000000e+00 : f32
      %59 = vector.broadcast %cst_31 : f32 to vector<32x128xf32>
      %60 = arith.select %36, %25, %59 : vector<32x128xi1>, vector<32x128xf32>
      %61 = vector.shape_cast %60 : vector<32x128xf32> to vector<4x8x128xf32>
      %cst_32 = arith.constant dense<0.000000e+00> : vector<8x128xf32>
      %62 = vector.multi_reduction <add>, %61, %cst_32 [0] : vector<4x8x128xf32> to vector<8x128xf32>
      %63 = arith.addf %58, %62 : vector<8x128xf32>
      %c0_33 = arith.constant 0 : index
      %c0_34 = arith.constant 0 : index
      %64 = vector.load %arg8[%c0_33, %c0_34] : memref<8x128xf32, #tpu.memory_space<vmem>>, vector<8x128xf32>
      tpu.vector_store %arg8[%c0_33, %c0_34], %63 {strides = array<i32>} : memref<8x128xf32, #tpu.memory_space<vmem>>, vector<8x128xf32>,
    } else {
    }
    %c0_i32_5 = arith.constant 0 : i32
    %11 = arith.cmpi eq, %arg1, %c0_i32_5 : i32
    %12 = arith.extui %11 : i1 to i32
    %c0_i32_6 = arith.constant 0 : i32
    %13 = arith.cmpi ne, %12, %c0_i32_6 : i32
    scf.if %13 {
      %c0 = arith.constant 0 : index
      %c0_7 = arith.constant 0 : index
      %14 = vector.load %arg5[%c0, %c0_7] : memref<8x128xf32, #tpu.memory_space<vmem>>, vector<8x128xf32>
      %c0_8 = arith.constant 0 : index
      %c0_9 = arith.constant 0 : index
      %c0_10 = arith.constant 0 : index
      %15 = vector.load %arg4[%c0_8, %c0_9, %c0_10] : memref<1x32x128xf32, #tpu.memory_space<vmem>>, vector<1x8x128xf32>
      %16 = vector.shape_cast %15 : vector<1x8x128xf32> to vector<8x128xf32>
      %17 = vector.shape_cast %14 : vector<8x128xf32> to vector<1x8x128xf32>
      tpu.vector_store %arg4[%c0_8, %c0_9, %c0_10], %17 {strides = array<i32>} : memref<1x32x128xf32, #tpu.memory_space<vmem>>, vector<1x8x128xf32>,
      %c0_11 = arith.constant 0 : index
      %c0_12 = arith.constant 0 : index
      %18 = vector.load %arg6[%c0_11, %c0_12] : memref<8x128xf32, #tpu.memory_space<vmem>>, vector<8x128xf32>
      %c0_13 = arith.constant 0 : index
      %c8 = arith.constant 8 : index
      %c0_14 = arith.constant 0 : index
      %19 = vector.load %arg4[%c0_13, %c8, %c0_14] : memref<1x32x128xf32, #tpu.memory_space<vmem>>, vector<1x8x128xf32>
      %20 = vector.shape_cast %19 : vector<1x8x128xf32> to vector<8x128xf32>
      %21 = vector.shape_cast %18 : vector<8x128xf32> to vector<1x8x128xf32>
      tpu.vector_store %arg4[%c0_13, %c8, %c0_14], %21 {strides = array<i32>} : memref<1x32x128xf32, #tpu.memory_space<vmem>>, vector<1x8x128xf32>,
      %c0_15 = arith.constant 0 : index
      %c0_16 = arith.constant 0 : index
      %22 = vector.load %arg7[%c0_15, %c0_16] : memref<8x128xf32, #tpu.memory_space<vmem>>, vector<8x128xf32>
      %c0_17 = arith.constant 0 : index
      %c16 = arith.constant 16 : index
      %c0_18 = arith.constant 0 : index
      %23 = vector.load %arg4[%c0_17, %c16, %c0_18] : memref<1x32x128xf32, #tpu.memory_space<vmem>>, vector<1x8x128xf32>
      %24 = vector.shape_cast %23 : vector<1x8x128xf32> to vector<8x128xf32>
      %25 = vector.shape_cast %22 : vector<8x128xf32> to vector<1x8x128xf32>
      tpu.vector_store %arg4[%c0_17, %c16, %c0_18], %25 {strides = array<i32>} : memref<1x32x128xf32, #tpu.memory_space<vmem>>, vector<1x8x128xf32>,
      %c0_19 = arith.constant 0 : index
      %c0_20 = arith.constant 0 : index
      %26 = vector.load %arg8[%c0_19, %c0_20] : memref<8x128xf32, #tpu.memory_space<vmem>>, vector<8x128xf32>
      %c0_21 = arith.constant 0 : index
      %c24 = arith.constant 24 : index
      %c0_22 = arith.constant 0 : index
      %27 = vector.load %arg4[%c0_21, %c24, %c0_22] : memref<1x32x128xf32, #tpu.memory_space<vmem>>, vector<1x8x128xf32>
      %28 = vector.shape_cast %27 : vector<1x8x128xf32> to vector<8x128xf32>
      %29 = vector.shape_cast %26 : vector<8x128xf32> to vector<1x8x128xf32>
      tpu.vector_store %arg4[%c0_21, %c24, %c0_22], %29 {strides = array<i32>} : memref<1x32x128xf32, #tpu.memory_space<vmem>>, vector<1x8x128xf32>,
    } else {
    }
    return
  }
  func.func @transform_0(%arg0: i32, %arg1: i32) -> (i32, i32) {
    %c1_i32 = arith.constant 1 : i32
    %0 = arith.muli %arg0, %c1_i32 : i32
    %1 = arith.addi %0, %arg1 : i32
    %c0_i32 = arith.constant 0 : i32
    %c0_i32_0 = arith.constant 0 : i32
    return %1, %c0_i32 : i32, i32
  }
  func.func @transform_1(%arg0: i32, %arg1: i32) -> (i32, i32) {
    %c1_i32 = arith.constant 1 : i32
    %0 = arith.muli %arg0, %c1_i32 : i32
    %1 = arith.addi %0, %arg1 : i32
    %c0_i32 = arith.constant 0 : i32
    %c0_i32_0 = arith.constant 0 : i32
    return %1, %c0_i32 : i32, i32
  }
  func.func @transform_2(%arg0: i32, %arg1: i32) -> (i32, i32, i32) {
    %c0_i32 = arith.constant 0 : i32
    %c0_i32_0 = arith.constant 0 : i32
    %c0_i32_1 = arith.constant 0 : i32
    return %arg0, %c0_i32, %c0_i32_0 : i32, i32, i32
  }
}

</mosaic_0001>

<bundles_post_ra>
// kernel: tpu_custom_call.1
= control target key start
LH: loop header
LB: loop body
LE: loop exit
PB: predicated region body
PF: predicated region fallthrough
CT: control target
= control target key end

     0   :  { %7 = vsyncpa [#allocation7], 0  ;;  %s566_s0 = inlined_call_operand.hbm [shape: f32[16,128], index: 0, kind: input, shape index: {}]   ;;  %s567_s1 = inlined_call_operand.hbm [shape: f32[16,128], index: 1, kind: input, shape index: {}]   ;;  %s568_s2 = inlined_call_operand.hbm [shape: f32[1,32,128], index: 2, kind: output, shape index: {}]  }
   0x1   :  { %8 = vsyncpa [#allocation10], 0 }
   0x2   :  { %9 = vsyncpa [#allocation8], 0 }
   0x3   :  { %18 = vsyncadd [#allocation7], 256  ;;  %s492_s9 = smov [#allocation6]   ;;  %s420_s13 = scalar_lea.hbm %s566_s0, 256 }
   0x4   :  { %s23_s10 = sshll.u32 %s492_s9, 4  ;;  %p421_p0 = scmp.ne.s32.totalorder %s566_s0, %s420_s13  ;;  %s24_s10 = int_to_ptr.vmem [resolvable:$true] %s23_s10 }
   0x5   :  { %p424_p1 = scmp.lt.u32.totalorder %s420_s13, %s566_s0 }
   0x7   :  { %p426_p2 = pnand %p424_p1, %p421_p0 }
   0x9   :  { %429 = shalt.err (!%p426_p2)
}
   0xa   :  { %s430_s18 = scalar_lea.vmem %s24_s10, 256  ;;  %s434_s19 = scalar_lea.vmem %s24_s10, 512 }
   0xb   :  { %p431_p3 = scmp.ne.s32.totalorder %s24_s10, %s430_s18  ;;  %p435_p4 = scmp.lt.s32.totalorder %s24_s10, %s24_s10 }
   0xc   :  { %p436_p5 = scmp.lt.s32.totalorder %s434_s19, %s430_s18 }
   0xe   :  { %p437_p6 = por %p436_p5, %p435_p4 }
  0x10   :  { %p438_p7 = pnand %p437_p6, %p431_p3 }
  0x12   :  { %441 = shalt.err (!%p438_p7)
}
  0x13   :  { %s493_s20 = smov 128   ;;  %s494_s21 = smov 8  }
  0x14   :  { %29 = dma.hbm_to_vmem [thread:$0]  %s566_s0, 256, %s24_s10, [#allocation7], %s493_s20, %s493_s20, %s494_s21  }
  0x15   :  { %38 = vsyncadd [#allocation10], 256  ;;  %s495_s24 = smov [#allocation9]   ;;  %s442_s28 = scalar_lea.hbm %s567_s1, 256 }
  0x16   :  { %s43_s25 = sshll.u32 %s495_s24, 4  ;;  %p443_p8 = scmp.ne.s32.totalorder %s567_s1, %s442_s28  ;;  %s44_s25 = int_to_ptr.vmem [resolvable:$true] %s43_s25 }
  0x17   :  { %p446_p9 = scmp.lt.u32.totalorder %s442_s28, %s567_s1 }
  0x19   :  { %p448_p10 = pnand %p446_p9, %p443_p8 }
  0x1b   :  { %451 = shalt.err (!%p448_p10)
}
  0x1c   :  { %s452_s5 = scalar_lea.vmem %s44_s25, 256  ;;  %s456_s0 = scalar_lea.vmem %s44_s25, 512 }
  0x1d   :  { %p453_p11 = scmp.ne.s32.totalorder %s44_s25, %s452_s5  ;;  %p457_p12 = scmp.lt.s32.totalorder %s44_s25, %s44_s25 }
  0x1e   :  { %p458_p13 = scmp.lt.s32.totalorder %s456_s0, %s452_s5 }
  0x20   :  { %p459_p0 = por %p458_p13, %p457_p12 }
  0x22   :  { %p460_p1 = pnand %p459_p0, %p453_p11 }
  0x24   :  { %463 = shalt.err (!%p460_p1)
}
  0x25   :  { %49 = dma.hbm_to_vmem [thread:$0]  %s567_s1, 256, %s44_s25, [#allocation10], %s493_s20, %s493_s20, %s494_s21  }
  0x26   :  { %486 = dma.done.wait [#allocation7], 512  }
  0x27   :  { %487 = vsyncadd [#allocation7], 4294966784 }
  0x28   :  { %488 = dma.done.wait [#allocation10], 512  }
  0x29   :  { %489 = vsyncadd [#allocation10], 4294966784  ;;  %v213_v0 = vld [vmem:[#allocation6] sm:$0xff]  ;;  %v214_v1 = vld [vmem:[#allocation6 + $0x8] sm:$0xff]  ;;  %v496_v6 = vmov 0.0   ;;  %s497_s1 = smov [#allocation11]  }
  0x2a   :  { %v217_v2 = vld [vmem:[#allocation9] sm:$0xff]  ;;  %v218_v3 = vld [vmem:[#allocation9 + $0x8] sm:$0xff]  ;;  %v233_v4 = vand.u32 2147483647, %v213_v0  ;;  %v234_v5 = vand.u32 2147483647, %v214_v1 }
  0x2b   :  { %vm289_vm0 = vcmp.eq.f32.partialorder %v217_v2, 1.0  ;;  %vm290_vm1 = vcmp.eq.f32.partialorder %v218_v3, 1.0  ;;  %vm293_vm2 = vcmp.eq.f32.partialorder %v217_v2, 0.0  ;;  %vm294_vm3 = vcmp.eq.f32.partialorder %v218_v3, 0.0  ;;  %s381_s8 = sshll.u32 %s497_s1, 4  ;;  %s382_s8 = int_to_ptr.vmem [resolvable:$true] %s381_s8 }
  0x2c   :  { %v402_v7 = vsel %vm289_vm0, 1.0, %v496_v6  ;;  %v237_v8 = vsub.f32 0.0, %v233_v4  ;;  %v238_v9 = vsub.f32 0.0, %v234_v5  ;;  %v403_v10 = vsel %vm290_vm1, 1.0, %v496_v6  ;;  %s464_s9 = scalar_lea.vmem %s382_s8, 512  ;;  %p469_p3 = scmp.lt.s32.totalorder %s382_s8, %s382_s8 }
  0x2d   :  { %v326_v11 = vadd.f32 %v403_v10, %v402_v7  ;;  %v404_v12 = vsel %vm293_vm2, 1.0, %v496_v6  ;;  %v405_v13 = vsel %vm294_vm3, 1.0, %v496_v6  ;;  %v225_v24 = vmul.f32 %v217_v2, %v213_v0  ;;  %p465_p2 = scmp.ne.s32.totalorder %s382_s8, %s464_s9  ;;  %p470_p4 = scmp.lt.s32.totalorder %s464_s9, %s464_s9 }
  0x2e   :  { %v241_v14 = vmul.f32 1.442695, %v237_v8  ;;  %v243_v15 = vmul.f32 1.442695, %v238_v9  ;;  %v340_v16 = vadd.f32 %v405_v13, %v404_v12  ;;  %v221_v25 = vmax.f32 %v213_v0, 0.0 }
  0x2f   :  { %369 = vst [vmem:[#allocation11] sm:$0xff] %v326_v11  ;;  %v226_v28 = vmul.f32 %v218_v3, %v214_v1  ;;  %v222_v29 = vmax.f32 %v214_v1, 0.0  ;;  %p471_p5 = por %p470_p4, %p469_p3 }
  0x30   :  { %412 = vpow2.f32 %v241_v14  ;;  %371 = vst [vmem:[#allocation11 + $0x8] sm:$0xff] %v340_v16  ;;  %v229_v33 = vsub.f32 %v221_v25, %v225_v24 }
  0x31   :  { %414 = vpow2.f32 %v243_v15  ;;  %v230_v36 = vsub.f32 %v222_v29, %v226_v28  ;;  %p472_p6 = pnand %p471_p5, %p465_p2 }
  0x3a   :  { %v413_v17 = vpop.eup %412 }
  0x3b   :  { %v415_v18 = vpop.eup %414  ;;  %v249_v19 = vadd.f32 1.0, %v413_v17  ;;  %v252_v21 = vmul.f32 -0.5, %v413_v17  ;;  %v255_v26 = vand.u32 2147483647, %v413_v17 }
  0x3c   :  { %v258_v20 = vadd.f32 1.0, %v415_v18  ;;  %v261_v22 = vmul.f32 -0.5, %v415_v18  ;;  %v264_v30 = vand.u32 2147483647, %v415_v18 }
  0x3d   :  { %416 = vlog2.f32 %v249_v19  ;;  %v253_v23 = vadd.f32 1.0, %v252_v21  ;;  %vm256_vm4 = vcmp.lt.f32.partialorder %v255_v26, 0.0004427343 }
  0x3e   :  { %418 = vlog2.f32 %v258_v20  ;;  %v262_v27 = vadd.f32 1.0, %v261_v22  ;;  %vm265_vm5 = vcmp.lt.f32.partialorder %v264_v30, 0.0004427343 }
  0x3f   :  { %v254_v31 = vmul.f32 %v413_v17, %v253_v23 }
  0x40   :  { %v263_v34 = vmul.f32 %v415_v18, %v262_v27 }
  0x47   :  { %v417_v32 = vpop.eup %416 }
  0x48   :  { %v419_v35 = vpop.eup %418  ;;  %v251_v37 = vmul.f32 0.6931472, %v417_v32 }
  0x49   :  { %v260_v38 = vmul.f32 0.6931472, %v419_v35 }
  0x4a   :  { %v257_v39 = vsel %vm256_vm4, %v254_v31, %v251_v37 }
  0x4b   :  { %v266_v40 = vsel %vm265_vm5, %v263_v34, %v260_v38  ;;  %v285_v41 = vadd.f32 %v257_v39, %v229_v33 }
  0x4c   :  { %v286_v42 = vadd.f32 %v266_v40, %v230_v36 }
  0x4d   :  { %v346_v43 = vsel %vm289_vm0, %v285_v41, 0.0  ;;  %v356_v44 = vsel %vm293_vm2, %v285_v41, 0.0 }
  0x4e   :  { %v347_v45 = vsel %vm290_vm1, %v286_v42, 0.0  ;;  %v357_v46 = vsel %vm294_vm3, %v286_v42, 0.0 }
  0x4f   :  { %v350_v47 = vadd.f32 %v347_v45, %v346_v43  ;;  %v360_v48 = vadd.f32 %v357_v46, %v356_v44 }
  0x51   :  { %373 = vst [vmem:[#allocation11 + $0x10] sm:$0xff] %v350_v47  ;;  %375 = vst [vmem:[#allocation11 + $0x18] sm:$0xff] %v360_v48 }
  0x52   :  { %475 = shalt.err (!%p472_p6)
}
  0x53   :  { %s476_s12 = scalar_lea.hbm %s568_s2, 512 }
  0x54   :  { %p477_p7 = scmp.ne.s32.totalorder %s568_s2, %s476_s12  ;;  %p480_p8 = scmp.lt.u32.totalorder %s476_s12, %s568_s2 }
  0x56   :  { %p482_p9 = pnand %p480_p8, %p477_p7 }
  0x58   :  { %485 = shalt.err (!%p482_p9)
}
  0x59   :  { %387 = dma.vmem_to_hbm [thread:$0]  %s382_s8, 512, %s568_s2, [#allocation8], %s493_s20, %s493_s20, %s494_s21  }
  0x5a   :  { %490 = dma.done.wait [#allocation8], 512  }
  0x5b   :  { %491 = vsyncadd [#allocation8], 4294966784 }
  0x5c   :  { %391 = vsyncpa [#allocation7], 1 }
  0x5d   :  { %392 = vsyncpa [#allocation10], 1 }
  0x5e   :  { %393 = vsyncpa [#allocation8], 1 }

</bundles_post_ra>
